<compile_context>
chip_gen: v6e
topology: v6e:2x2x1
jax: 0.10.0
libtpu: 0.0.40
codegen_flags: <defaults>
</compile_context>

<pallas_src>
import functools

import jax
import jax.numpy as jnp
from jax import lax
from jax.experimental import pallas as pl
from jax.experimental.pallas import tpu as pltpu


def _lsa_kernel(x_ref, wqkv_ref, wo_ref, bo_ref, o_ref, ctx_ref, *,
                heads, dim_head, tb, n, compute_dtype, approx_recip):
    # x_ref:    (TB*N, D)      VMEM (input dtype)
    # wqkv_ref: (D, 3*H*dh)    VMEM (compute_dtype, temperature pre-folded into W_q)
    # wo_ref:   (H*dh, D)      VMEM (compute_dtype)
    # bo_ref:   (1, D)         VMEM (f32)
    # o_ref:    (TB*N, D)      VMEM (input dtype)
    # ctx_ref:  (TB*N, H*dh)   VMEM f32 scratch (merged per-head context)
    inner = heads * dim_head
    rows = tb * n

    # Fused QKV projection for all TB examples at once (MXU, f32 accumulate),
    # then a single cast to the MXU operand dtype.
    xm = x_ref[...].astype(compute_dtype)
    qkv = jnp.dot(xm, wqkv_ref[...],
                  preferred_element_type=jnp.float32).astype(compute_dtype)

    # Non-diagonal mask (1 everywhere, 0 on the self-token diagonal); built
    # once per grid step and reused for every head (VPU-cheap).
    row = lax.broadcasted_iota(jnp.int32, (n, n), 0)
    col = lax.broadcasted_iota(jnp.int32, (n, n), 1)
    nondiag = (row != col).astype(jnp.float32)[None, :, :]          # (1, N, N)

    # Static (unrolled) head loop; lane-slices instead of head-split transposes.
    for h in range(heads):
        lo = h * dim_head
        hi = lo + dim_head
        qb = qkv[:, lo:hi].reshape(tb, n, dim_head)                  # (TB, N, dh)
        kb = qkv[:, inner + lo:inner + hi].reshape(tb, n, dim_head)
        vb = qkv[:, 2 * inner + lo:2 * inner + hi].reshape(tb, n, dim_head)

        # dots[b, i, j] = sum_d q[b,i,d] * k[b,j,d]   (batched, no transpose)
        dots = lax.dot_general(
            qb, kb,
            dimension_numbers=(((2,), (2,)), ((0,), (0,))),
            preferred_element_type=jnp.float32)                      # (TB, N, N) f32

        # Numerically-stable softmax over keys; diagonal removed post-exp
        # (identical to masked_fill(-finfo.max) before softmax).
        m = jnp.max(dots, axis=-1, keepdims=True)
        e = jnp.exp(dots - m) * nondiag
        s = jnp.sum(e, axis=-1, keepdims=True)
        attn = e * pl.reciprocal(s, approx=approx_recip)             # (TB, N, N) f32

        # ctx[b, i, d] = sum_j attn[b,i,j] * v[b,j,d]
        ctx = lax.dot_general(
            attn.astype(compute_dtype), vb,
            dimension_numbers=(((2,), (1,)), ((0,), (0,))),
            preferred_element_type=jnp.float32)                      # (TB, N, dh) f32

        # Merge heads by writing into the scratch at a static lane offset
        # (no 'b h n d -> b n (h d)' transpose, no per-head output matmul).
        ctx_ref[:, lo:hi] = ctx.reshape(rows, dim_head)

    # Single output projection over all heads: (rows, inner) @ (inner, D).
    y = jnp.dot(ctx_ref[...].astype(compute_dtype), wo_ref[...],
                preferred_element_type=jnp.float32) + bo_ref[...]
    o_ref[...] = y.astype(o_ref.dtype)


def _choose_batch_tile(batch, n, max_rows=1024):
    """Pick a batch tile TB such that:
       * TB divides batch,
       * TB*N is sublane-aligned (TB*N % 8 == 0) OR TB == batch (full-extent block),
       * TB*N stays modest (<= max_rows) to bound VMEM,
       * >= 2 grid steps are kept when possible (v7x megacore)."""
    divisors = [t for t in range(1, batch + 1) if batch % t == 0]
    aligned = [t for t in divisors if (t * n) % 8 == 0 or t == batch]
    if not aligned:
        aligned = [batch]
    small = [t for t in aligned if t * n <= max_rows]
    pool = small if small else [min(aligned)]
    multi = [t for t in pool if batch // t >= 2]
    return max(multi) if multi else max(pool)


def lsa_forward(x, w_qkv, w_out, b_out, temperature, *, heads, dim_head,
                compute_dtype=jnp.bfloat16, approx_recip=True, batch_tile=None):
    """x: (B, N, D).  w_qkv: (D, 3*H*dh).  w_out: (H*dh, D).  b_out: (D,).
    temperature: shape-(1,) log-temperature parameter.

    compute_dtype: MXU operand dtype (bf16 = fast path on v6e/v7x;
                   jnp.float32 for bit-faithful parity checks).
    """
    B, N, D = x.shape
    inner = heads * dim_head
    tb = batch_tile if batch_tile is not None else _choose_batch_tile(B, N)
    assert B % tb == 0
    grid_b = B // tb

    # Present x / out as sublane-dense 2-D slabs: (B*N, D).
    x2 = x.reshape(B * N, D)

    # Fold exp(temperature) into W_q (weights only, once per call) -> no
    # per-step scale multiply and no SMEM scalar inside the kernel.
    scale = jnp.exp(temperature).astype(jnp.float32)
    wqkv_scaled = jnp.concatenate([w_qkv[:, :inner] * scale, w_qkv[:, inner:]],
                                  axis=-1)
    wqkv_c = wqkv_scaled.astype(compute_dtype)
    wo_c = w_out.astype(compute_dtype)
    bo = b_out.reshape(1, D).astype(jnp.float32)

    kernel = functools.partial(
        _lsa_kernel, heads=heads, dim_head=dim_head, tb=tb, n=N,
        compute_dtype=compute_dtype, approx_recip=approx_recip)

    y = pl.pallas_call(
        kernel,
        out_shape=jax.ShapeDtypeStruct((B * N, D), x.dtype),
        grid_spec=pltpu.PrefetchScalarGridSpec(
            num_scalar_prefetch=0,
            grid=(grid_b,),
            in_specs=[
                pl.BlockSpec((tb * N, D), lambda b: (b, 0)),       # x slab
                # Weights use constant index_maps (no re-DMA across steps).
                pl.BlockSpec((D, 3 * inner), lambda b: (0, 0)),    # w_qkv (scaled)
                pl.BlockSpec((inner, D), lambda b: (0, 0)),        # w_out
                pl.BlockSpec((1, D), lambda b: (0, 0)),            # b_out
            ],
            out_specs=pl.BlockSpec((tb * N, D), lambda b: (b, 0)),
            scratch_shapes=[pltpu.VMEM((tb * N, inner), jnp.float32)],  # merged ctx
        ),
        compiler_params=pltpu.CompilerParams(
            dimension_semantics=("parallel",),
            vmem_limit_bytes=32 * 1024 * 1024),
    )(x2, wqkv_c, wo_c, bo)
    return y.reshape(B, N, D)


def lsa_reference(x, w_qkv, w_out, b_out, temperature, *, heads, dim_head):
    """Pure-JAX f32 reference mirroring the PyTorch forward (dropout = 0)."""
    B, N, D = x.shape
    inner = heads * dim_head
    qkv = jnp.einsum('bnd,de->bne', x, w_qkv)
    q, k, v = jnp.split(qkv, 3, axis=-1)

    def split_heads(t):
        return t.reshape(B, N, heads, dim_head).transpose(0, 2, 1, 3)

    q, k, v = map(split_heads, (q, k, v))
    dots = jnp.einsum('bhqd,bhkd->bhqk', q, k) * jnp.exp(temperature[0])
    mask = jnp.eye(N, dtype=bool)
    dots = jnp.where(mask[None, None], -jnp.finfo(dots.dtype).max, dots)
    attn = jax.nn.softmax(dots, axis=-1)
    out = jnp.einsum('bhqk,bhkd->bhqd', attn, v)
    out = out.transpose(0, 2, 1, 3).reshape(B, N, inner)
    return jnp.einsum('bni,id->bnd', out, w_out) + b_out[None, None, :]


if __name__ == "__main__":
    # Small shapes consistent with the module.
    B, N, D = 2, 8, 32
    heads, dim_head = 4, 16
    inner = heads * dim_head

    key = jax.random.PRNGKey(0)
    k_x, k_qkv, k_wo, k_bo = jax.random.split(key, 4)

    x = jax.random.normal(k_x, (B, N, D), dtype=jnp.float32)
    # Linear weights stored already transposed so that y = x @ W.
    w_qkv = jax.random.normal(k_qkv, (D, 3 * inner), dtype=jnp.float32) * (1.0 / jnp.sqrt(D))
    w_out = jax.random.normal(k_wo, (inner, D), dtype=jnp.float32) * (1.0 / jnp.sqrt(inner))
    b_out = jax.random.normal(k_bo, (D,), dtype=jnp.float32) * 0.01
    # temperature = log(dim_head ** -0.5)
    temperature = jnp.array([jnp.log(dim_head ** -0.5)], dtype=jnp.float32)

    y_ref = lsa_reference(x, w_qkv, w_out, b_out, temperature,
                          heads=heads, dim_head=dim_head)

    # Performance configuration: bf16 MXU operands, f32 accumulation/softmax,
    # EUP approximate reciprocal. Compared with a bf16-appropriate tolerance.
    y_fast = lsa_forward(x, w_qkv, w_out, b_out, temperature,
                         heads=heads, dim_head=dim_head,
                         compute_dtype=jnp.bfloat16, approx_recip=True)
    y_fast = jax.block_until_ready(y_fast)
    assert y_fast.shape == (B, N, D)
    assert jnp.allclose(y_fast, y_ref, atol=1e-1, rtol=1e-1), \
        "bf16 kernel mismatch vs reference"

    # Strict f32 parity check of the same kernel structure.
    y_f32 = lsa_forward(x, w_qkv, w_out, b_out, temperature,
                        heads=heads, dim_head=dim_head,
                        compute_dtype=jnp.float32, approx_recip=False)
    y_f32 = jax.block_until_ready(y_f32)
    assert jnp.allclose(y_f32, y_ref, atol=1e-4, rtol=1e-4), \
        "f32 kernel mismatch vs reference"

    print("KERNEL_OK")
</pallas_src>

<mosaic_0001>
module attributes {stable_mosaic.version = 11 : i64} {
  func.func @_lsa_kernel(%arg0: i32, %arg1: memref<8x32xf32, #tpu.memory_space<vmem>>, %arg2: memref<32x192xbf16, #tpu.memory_space<vmem>>, %arg3: memref<64x32xbf16, #tpu.memory_space<vmem>>, %arg4: memref<1x32xf32, #tpu.memory_space<vmem>>, %arg5: memref<8x32xf32, #tpu.memory_space<vmem>>, %arg6: memref<8x64xf32, #tpu.memory_space<vmem>>) attributes {dimension_semantics = [#tpu.dimension_semantics<parallel>], iteration_bounds = array<i64: 2>, scalar_prefetch = 0 : i64, scratch_operands = 1 : i64, tpu.core_type = #tpu.core_type<tc>, window_params = [{transform_indices = @transform_0, window_bounds = array<i64: 8, 32>}, {pipeline_mode = #tpu.pipeline_mode<synchronous>, transform_indices = @transform_1, window_bounds = array<i64: 32, 192>}, {pipeline_mode = #tpu.pipeline_mode<synchronous>, transform_indices = @transform_2, window_bounds = array<i64: 64, 32>}, {pipeline_mode = #tpu.pipeline_mode<synchronous>, transform_indices = @transform_3, window_bounds = array<i64: 1, 32>}, {transform_indices = @transform_4, window_bounds = array<i64: 8, 32>}]} {
    %c0 = arith.constant 0 : index
    %c0_0 = arith.constant 0 : index
    %0 = vector.load %arg1[%c0, %c0_0] : memref<8x32xf32, #tpu.memory_space<vmem>>, vector<8x32xf32>
    %1 = arith.truncf %0 : vector<8x32xf32> to vector<8x32xbf16>
    %c0_1 = arith.constant 0 : index
    %c0_2 = arith.constant 0 : index
    %2 = vector.load %arg2[%c0_1, %c0_2] : memref<32x192xbf16, #tpu.memory_space<vmem>>, vector<32x192xbf16>
    %cst = arith.constant dense<0.000000e+00> : vector<8x192xf32>
    %3 = tpu.matmul %1, %2, %cst {dimension_numbers = #tpu.dot_dimension_numbers<[1], [0], [0], [1], [0, 0, 1, 1], [], []>} : vector<8x32xbf16>, vector<32x192xbf16>, vector<8x192xf32> -> vector<8x192xf32>
    %4 = arith.truncf %3 : vector<8x192xf32> to vector<8x192xbf16>
    %5 = tpu.iota {dimensions = array<i32: 0>} : vector<8x8xi32>
    %6 = tpu.iota {dimensions = array<i32: 1>} : vector<8x8xi32>
    %7 = arith.cmpi ne, %5, %6 : vector<8x8xi32>
    %8 = arith.extui %7 : vector<8x8xi1> to vector<8x8xi32>
    %9 = arith.sitofp %8 : vector<8x8xi32> to vector<8x8xf32>
    %10 = vector.shape_cast %9 : vector<8x8xf32> to vector<1x8x8xf32>
    %11 = vector.extract_strided_slice %4 {offsets = [0, 0], sizes = [8, 16], strides = [1, 1]} : vector<8x192xbf16> to vector<8x16xbf16>
    %12 = vector.shape_cast %11 : vector<8x16xbf16> to vector<1x8x16xbf16>
    %13 = vector.extract_strided_slice %4 {offsets = [0, 64], sizes = [8, 16], strides = [1, 1]} : vector<8x192xbf16> to vector<8x16xbf16>
    %14 = vector.shape_cast %13 : vector<8x16xbf16> to vector<1x8x16xbf16>
    %15 = vector.extract_strided_slice %4 {offsets = [0, 128], sizes = [8, 16], strides = [1, 1]} : vector<8x192xbf16> to vector<8x16xbf16>
    %16 = vector.shape_cast %15 : vector<8x16xbf16> to vector<1x8x16xbf16>
    %cst_3 = arith.constant dense<0.000000e+00> : vector<1x8x8xf32>
    %17 = tpu.matmul %12, %14, %cst_3 {dimension_numbers = #tpu.dot_dimension_numbers<[2], [2], [1], [1], [0, 0, 0, 1, 1, 1], [0], [0]>} : vector<1x8x16xbf16>, vector<1x8x16xbf16>, vector<1x8x8xf32> -> vector<1x8x8xf32>
    %cst_4 = arith.constant dense<0xFF800000> : vector<1x8xf32>
    %18 = vector.multi_reduction <maximumf>, %17, %cst_4 [2] : vector<1x8x8xf32> to vector<1x8xf32>
    %19 = vector.shape_cast %18 : vector<1x8xf32> to vector<1x8x1xf32>
    %20 = vector.broadcast %19 : vector<1x8x1xf32> to vector<1x8x8xf32>
    %21 = arith.subf %17, %20 : vector<1x8x8xf32>
    %22 = math.exp %21 : vector<1x8x8xf32>
    %23 = arith.mulf %22, %10 : vector<1x8x8xf32>
    %cst_5 = arith.constant dense<0.000000e+00> : vector<1x8xf32>
    %24 = vector.multi_reduction <add>, %23, %cst_5 [2] : vector<1x8x8xf32> to vector<1x8xf32>
    %25 = vector.shape_cast %24 : vector<1x8xf32> to vector<1x8x1xf32>
    %26 = tpu.reciprocal %25 {approx = true} : vector<1x8x1xf32> -> vector<1x8x1xf32>
    %27 = vector.broadcast %26 : vector<1x8x1xf32> to vector<1x8x8xf32>
    %28 = arith.mulf %23, %27 : vector<1x8x8xf32>
    %29 = arith.truncf %28 : vector<1x8x8xf32> to vector<1x8x8xbf16>
    %cst_6 = arith.constant dense<0.000000e+00> : vector<1x8x16xf32>
    %30 = tpu.matmul %29, %16, %cst_6 {dimension_numbers = #tpu.dot_dimension_numbers<[2], [1], [1], [2], [0, 0, 0, 1, 1, 2], [0], [0]>} : vector<1x8x8xbf16>, vector<1x8x16xbf16>, vector<1x8x16xf32> -> vector<1x8x16xf32>
    %31 = vector.shape_cast %30 : vector<1x8x16xf32> to vector<8x16xf32>
    %c0_7 = arith.constant 0 : index
    %c0_8 = arith.constant 0 : index
    %32 = vector.load %arg6[%c0_7, %c0_8] : memref<8x64xf32, #tpu.memory_space<vmem>>, vector<8x16xf32>
    tpu.vector_store %arg6[%c0_7, %c0_8], %31 {strides = array<i32>} : memref<8x64xf32, #tpu.memory_space<vmem>>, vector<8x16xf32>,
    %33 = vector.extract_strided_slice %4 {offsets = [0, 16], sizes = [8, 16], strides = [1, 1]} : vector<8x192xbf16> to vector<8x16xbf16>
    %34 = vector.shape_cast %33 : vector<8x16xbf16> to vector<1x8x16xbf16>
    %35 = vector.extract_strided_slice %4 {offsets = [0, 80], sizes = [8, 16], strides = [1, 1]} : vector<8x192xbf16> to vector<8x16xbf16>
    %36 = vector.shape_cast %35 : vector<8x16xbf16> to vector<1x8x16xbf16>
    %37 = vector.extract_strided_slice %4 {offsets = [0, 144], sizes = [8, 16], strides = [1, 1]} : vector<8x192xbf16> to vector<8x16xbf16>
    %38 = vector.shape_cast %37 : vector<8x16xbf16> to vector<1x8x16xbf16>
    %cst_9 = arith.constant dense<0.000000e+00> : vector<1x8x8xf32>
    %39 = tpu.matmul %34, %36, %cst_9 {dimension_numbers = #tpu.dot_dimension_numbers<[2], [2], [1], [1], [0, 0, 0, 1, 1, 1], [0], [0]>} : vector<1x8x16xbf16>, vector<1x8x16xbf16>, vector<1x8x8xf32> -> vector<1x8x8xf32>
    %cst_10 = arith.constant dense<0xFF800000> : vector<1x8xf32>
    %40 = vector.multi_reduction <maximumf>, %39, %cst_10 [2] : vector<1x8x8xf32> to vector<1x8xf32>
    %41 = vector.shape_cast %40 : vector<1x8xf32> to vector<1x8x1xf32>
    %42 = vector.broadcast %41 : vector<1x8x1xf32> to vector<1x8x8xf32>
    %43 = arith.subf %39, %42 : vector<1x8x8xf32>
    %44 = math.exp %43 : vector<1x8x8xf32>
    %45 = arith.mulf %44, %10 : vector<1x8x8xf32>
    %cst_11 = arith.constant dense<0.000000e+00> : vector<1x8xf32>
    %46 = vector.multi_reduction <add>, %45, %cst_11 [2] : vector<1x8x8xf32> to vector<1x8xf32>
    %47 = vector.shape_cast %46 : vector<1x8xf32> to vector<1x8x1xf32>
    %48 = tpu.reciprocal %47 {approx = true} : vector<1x8x1xf32> -> vector<1x8x1xf32>
    %49 = vector.broadcast %48 : vector<1x8x1xf32> to vector<1x8x8xf32>
    %50 = arith.mulf %45, %49 : vector<1x8x8xf32>
    %51 = arith.truncf %50 : vector<1x8x8xf32> to vector<1x8x8xbf16>
    %cst_12 = arith.constant dense<0.000000e+00> : vector<1x8x16xf32>
    %52 = tpu.matmul %51, %38, %cst_12 {dimension_numbers = #tpu.dot_dimension_numbers<[2], [1], [1], [2], [0, 0, 0, 1, 1, 2], [0], [0]>} : vector<1x8x8xbf16>, vector<1x8x16xbf16>, vector<1x8x16xf32> -> vector<1x8x16xf32>
    %53 = vector.shape_cast %52 : vector<1x8x16xf32> to vector<8x16xf32>
    %c0_13 = arith.constant 0 : index
    %c16 = arith.constant 16 : index
    %54 = vector.load %arg6[%c0_13, %c16] : memref<8x64xf32, #tpu.memory_space<vmem>>, vector<8x16xf32>
    tpu.vector_store %arg6[%c0_13, %c16], %53 {strides = array<i32>} : memref<8x64xf32, #tpu.memory_space<vmem>>, vector<8x16xf32>,
    %55 = vector.extract_strided_slice %4 {offsets = [0, 32], sizes = [8, 16], strides = [1, 1]} : vector<8x192xbf16> to vector<8x16xbf16>
    %56 = vector.shape_cast %55 : vector<8x16xbf16> to vector<1x8x16xbf16>
    %57 = vector.extract_strided_slice %4 {offsets = [0, 96], sizes = [8, 16], strides = [1, 1]} : vector<8x192xbf16> to vector<8x16xbf16>
    %58 = vector.shape_cast %57 : vector<8x16xbf16> to vector<1x8x16xbf16>
    %59 = vector.extract_strided_slice %4 {offsets = [0, 160], sizes = [8, 16], strides = [1, 1]} : vector<8x192xbf16> to vector<8x16xbf16>
    %60 = vector.shape_cast %59 : vector<8x16xbf16> to vector<1x8x16xbf16>
    %cst_14 = arith.constant dense<0.000000e+00> : vector<1x8x8xf32>
    %61 = tpu.matmul %56, %58, %cst_14 {dimension_numbers = #tpu.dot_dimension_numbers<[2], [2], [1], [1], [0, 0, 0, 1, 1, 1], [0], [0]>} : vector<1x8x16xbf16>, vector<1x8x16xbf16>, vector<1x8x8xf32> -> vector<1x8x8xf32>
    %cst_15 = arith.constant dense<0xFF800000> : vector<1x8xf32>
    %62 = vector.multi_reduction <maximumf>, %61, %cst_15 [2] : vector<1x8x8xf32> to vector<1x8xf32>
    %63 = vector.shape_cast %62 : vector<1x8xf32> to vector<1x8x1xf32>
    %64 = vector.broadcast %63 : vector<1x8x1xf32> to vector<1x8x8xf32>
    %65 = arith.subf %61, %64 : vector<1x8x8xf32>
    %66 = math.exp %65 : vector<1x8x8xf32>
    %67 = arith.mulf %66, %10 : vector<1x8x8xf32>
    %cst_16 = arith.constant dense<0.000000e+00> : vector<1x8xf32>
    %68 = vector.multi_reduction <add>, %67, %cst_16 [2] : vector<1x8x8xf32> to vector<1x8xf32>
    %69 = vector.shape_cast %68 : vector<1x8xf32> to vector<1x8x1xf32>
    %70 = tpu.reciprocal %69 {approx = true} : vector<1x8x1xf32> -> vector<1x8x1xf32>
    %71 = vector.broadcast %70 : vector<1x8x1xf32> to vector<1x8x8xf32>
    %72 = arith.mulf %67, %71 : vector<1x8x8xf32>
    %73 = arith.truncf %72 : vector<1x8x8xf32> to vector<1x8x8xbf16>
    %cst_17 = arith.constant dense<0.000000e+00> : vector<1x8x16xf32>
    %74 = tpu.matmul %73, %60, %cst_17 {dimension_numbers = #tpu.dot_dimension_numbers<[2], [1], [1], [2], [0, 0, 0, 1, 1, 2], [0], [0]>} : vector<1x8x8xbf16>, vector<1x8x16xbf16>, vector<1x8x16xf32> -> vector<1x8x16xf32>
    %75 = vector.shape_cast %74 : vector<1x8x16xf32> to vector<8x16xf32>
    %c0_18 = arith.constant 0 : index
    %c32 = arith.constant 32 : index
    %76 = vector.load %arg6[%c0_18, %c32] : memref<8x64xf32, #tpu.memory_space<vmem>>, vector<8x16xf32>
    tpu.vector_store %arg6[%c0_18, %c32], %75 {strides = array<i32>} : memref<8x64xf32, #tpu.memory_space<vmem>>, vector<8x16xf32>,
    %77 = vector.extract_strided_slice %4 {offsets = [0, 48], sizes = [8, 16], strides = [1, 1]} : vector<8x192xbf16> to vector<8x16xbf16>
    %78 = vector.shape_cast %77 : vector<8x16xbf16> to vector<1x8x16xbf16>
    %79 = vector.extract_strided_slice %4 {offsets = [0, 112], sizes = [8, 16], strides = [1, 1]} : vector<8x192xbf16> to vector<8x16xbf16>
    %80 = vector.shape_cast %79 : vector<8x16xbf16> to vector<1x8x16xbf16>
    %81 = vector.extract_strided_slice %4 {offsets = [0, 176], sizes = [8, 16], strides = [1, 1]} : vector<8x192xbf16> to vector<8x16xbf16>
    %82 = vector.shape_cast %81 : vector<8x16xbf16> to vector<1x8x16xbf16>
    %cst_19 = arith.constant dense<0.000000e+00> : vector<1x8x8xf32>
    %83 = tpu.matmul %78, %80, %cst_19 {dimension_numbers = #tpu.dot_dimension_numbers<[2], [2], [1], [1], [0, 0, 0, 1, 1, 1], [0], [0]>} : vector<1x8x16xbf16>, vector<1x8x16xbf16>, vector<1x8x8xf32> -> vector<1x8x8xf32>
    %cst_20 = arith.constant dense<0xFF800000> : vector<1x8xf32>
    %84 = vector.multi_reduction <maximumf>, %83, %cst_20 [2] : vector<1x8x8xf32> to vector<1x8xf32>
    %85 = vector.shape_cast %84 : vector<1x8xf32> to vector<1x8x1xf32>
    %86 = vector.broadcast %85 : vector<1x8x1xf32> to vector<1x8x8xf32>
    %87 = arith.subf %83, %86 : vector<1x8x8xf32>
    %88 = math.exp %87 : vector<1x8x8xf32>
    %89 = arith.mulf %88, %10 : vector<1x8x8xf32>
    %cst_21 = arith.constant dense<0.000000e+00> : vector<1x8xf32>
    %90 = vector.multi_reduction <add>, %89, %cst_21 [2] : vector<1x8x8xf32> to vector<1x8xf32>
    %91 = vector.shape_cast %90 : vector<1x8xf32> to vector<1x8x1xf32>
    %92 = tpu.reciprocal %91 {approx = true} : vector<1x8x1xf32> -> vector<1x8x1xf32>
    %93 = vector.broadcast %92 : vector<1x8x1xf32> to vector<1x8x8xf32>
    %94 = arith.mulf %89, %93 : vector<1x8x8xf32>
    %95 = arith.truncf %94 : vector<1x8x8xf32> to vector<1x8x8xbf16>
    %cst_22 = arith.constant dense<0.000000e+00> : vector<1x8x16xf32>
    %96 = tpu.matmul %95, %82, %cst_22 {dimension_numbers = #tpu.dot_dimension_numbers<[2], [1], [1], [2], [0, 0, 0, 1, 1, 2], [0], [0]>} : vector<1x8x8xbf16>, vector<1x8x16xbf16>, vector<1x8x16xf32> -> vector<1x8x16xf32>
    %97 = vector.shape_cast %96 : vector<1x8x16xf32> to vector<8x16xf32>
    %c0_23 = arith.constant 0 : index
    %c48 = arith.constant 48 : index
    %98 = vector.load %arg6[%c0_23, %c48] : memref<8x64xf32, #tpu.memory_space<vmem>>, vector<8x16xf32>
    tpu.vector_store %arg6[%c0_23, %c48], %97 {strides = array<i32>} : memref<8x64xf32, #tpu.memory_space<vmem>>, vector<8x16xf32>,
    %c0_24 = arith.constant 0 : index
    %c0_25 = arith.constant 0 : index
    %99 = vector.load %arg6[%c0_24, %c0_25] : memref<8x64xf32, #tpu.memory_space<vmem>>, vector<8x64xf32>
    %100 = arith.truncf %99 : vector<8x64xf32> to vector<8x64xbf16>
    %c0_26 = arith.constant 0 : index
    %c0_27 = arith.constant 0 : index
    %101 = vector.load %arg3[%c0_26, %c0_27] : memref<64x32xbf16, #tpu.memory_space<vmem>>, vector<64x32xbf16>
    %cst_28 = arith.constant dense<0.000000e+00> : vector<8x32xf32>
    %102 = tpu.matmul %100, %101, %cst_28 {dimension_numbers = #tpu.dot_dimension_numbers<[1], [0], [0], [1], [0, 0, 1, 1], [], []>} : vector<8x64xbf16>, vector<64x32xbf16>, vector<8x32xf32> -> vector<8x32xf32>
    %c0_29 = arith.constant 0 : index
    %c0_30 = arith.constant 0 : index
    %103 = vector.load %arg4[%c0_29, %c0_30] : memref<1x32xf32, #tpu.memory_space<vmem>>, vector<1x32xf32>
    %104 = vector.broadcast %103 : vector<1x32xf32> to vector<8x32xf32>
    %105 = arith.addf %102, %104 : vector<8x32xf32>
    %c0_31 = arith.constant 0 : index
    %c0_32 = arith.constant 0 : index
    %106 = vector.load %arg5[%c0_31, %c0_32] : memref<8x32xf32, #tpu.memory_space<vmem>>, vector<8x32xf32>
    tpu.vector_store %arg5[%c0_31, %c0_32], %105 {strides = array<i32>} : memref<8x32xf32, #tpu.memory_space<vmem>>, vector<8x32xf32>,
    return
  }
  func.func @transform_0(%arg0: i32) -> (i32, i32) {
    %c0_i32 = arith.constant 0 : i32
    %c0_i32_0 = arith.constant 0 : i32
    return %arg0, %c0_i32 : i32, i32
  }
  func.func @transform_1(%arg0: i32) -> (i32, i32) {
    %c0_i32 = arith.constant 0 : i32
    %c0_i32_0 = arith.constant 0 : i32
    %c0_i32_1 = arith.constant 0 : i32
    return %c0_i32, %c0_i32_0 : i32, i32
  }
  func.func @transform_2(%arg0: i32) -> (i32, i32) {
    %c0_i32 = arith.constant 0 : i32
    %c0_i32_0 = arith.constant 0 : i32
    %c0_i32_1 = arith.constant 0 : i32
    return %c0_i32, %c0_i32_0 : i32, i32
  }
  func.func @transform_3(%arg0: i32) -> (i32, i32) {
    %c0_i32 = arith.constant 0 : i32
    %c0_i32_0 = arith.constant 0 : i32
    %c0_i32_1 = arith.constant 0 : i32
    return %c0_i32, %c0_i32_0 : i32, i32
  }
  func.func @transform_4(%arg0: i32) -> (i32, i32) {
    %c0_i32 = arith.constant 0 : i32
    %c0_i32_0 = arith.constant 0 : i32
    return %arg0, %c0_i32 : i32, i32
  }
}

</mosaic_0001>

<bundles_post_ra>
// kernel: tpu_custom_call.1
= control target key start
LH: loop header
LB: loop body
LE: loop exit
PB: predicated region body
PF: predicated region fallthrough
CT: control target
= control target key end

     0   :  { %9 = vsyncpa [#allocation4], 0  ;;  %s1383_s0 = inlined_call_operand.vmem [shape: f32[16,32], index: 0, kind: input, shape index: {}]   ;;  %s1384_s1 = inlined_call_operand.vmem [shape: bf16[32,192], index: 1, kind: input, shape index: {}]   ;;  %s1385_s2 = inlined_call_operand.vmem [shape: bf16[64,32], index: 2, kind: input, shape index: {}]   ;;  %s1386_s3 = inlined_call_operand.vmem [shape: f32[1,32], index: 3, kind: input, shape index: {}]   ;;  %s1387_s4 = inlined_call_operand.hbm [shape: f32[16,32], index: 4, kind: output, shape index: {}]  }
   0x1   :  { %11 = vsyncpa [#allocation4 + $0x1], 0  ;;  %s1181_s15 = smov 0   ;;  %s1183_s16 = smov 0  }
   0x2   :  { %s1185_s17 = smov 0   ;;  %s1187_s18 = smov 0  }
   0x3 LB: > { %s1202_s19 = sadd.s32 4294967295, %s1143_s18   ;;  %s897_s20 = sadd.s32 4294967294, %s1143_s18   ;;  %s1143_s18 = sphi %s1187_s18, %s1393_s18   ;;  %s1139_s17 = sphi %s1185_s17, %s1392_s17   ;;  %s1135_s16 = sphi %s1183_s16, %s1391_s16   ;;  %s1131_s15 = sphi %s1181_s15, %s1390_s15  }
   0x4   : > { %s1206_s21 = sadd.s32 1, %s1143_s18   ;;  %s113_s22 = sadd.s32 1, %s1139_s17 }
   0x5   : > { %s110_s23 = ssub.s32 %s1143_s18, %s1206_s21  ;;  %p123_p0 = scmp.ne.s32.totalorder %s1139_s17, %s1135_s16 }
   0x6   : > { %p111_p1 = scmp.eq.s32.totalorder %s110_s23, 0  ;;  %p124_p2 = scmp.eq.s32.totalorder %s1202_s19, 1 }
   0x7   : > { %p129_p3 = scmp.ne.s32.totalorder %s1135_s16, %s1131_s15  ;;  %p130_p4 = scmp.eq.s32.totalorder %s897_s20, 1 }
   0x8   : > { %s1217_s24 = scalar_select %p111_p1, %s1139_s17, %s113_s22  }
   0x9   : > { %p1219_p5 = por %p124_p2, %p123_p0  ;;  %p1223_p6 = por %p130_p4, %p129_p3 }
   0xa   : > { %p900_p7 = scmp.ge.s32.totalorder %s1143_s18, 1  ;;  %p164_p8 = scmp.lt.s32.totalorder %s1143_s18, 3 }
   0xc   : > { %p165_p9 = pnand %p900_p7, %p164_p8 }
   0xd   : > { %p189_p10 = scmp.lt.s32.totalorder (!%p165_p9), %s1202_s19, 1  ;;  %s1148_s14 = smov (!%p165_p9), 112  }
   0xe   : > { %168 = sbr.rel (%p165_p9) target bundleno = 1443 (0x5a3), region = 36  ;;  %s1149_s20 = smov (!%p165_p9), 64  }
   0xf   : > { %s1150_s22 = smov (!%p165_p9), 32   ;;  %s1151_s23 = smov (!%p165_p9), 48  }
  0x10   : > { %s1152_s27 = smov (!%p165_p9), 16   ;;  %s1153_s28 = smov (!%p165_p9), 96  }
  0x11   : > { %s1154_s29 = smov (!%p165_p9), 80   ;;  %s186_s12 = sand.u32 (!%p165_p9), 1, %s1135_s16  }
  0x12   : > { %s825_s5 = scalar_lea.sflag (!%p165_p9), [#allocation4], %s186_s12  ;;  %s1155_s6 = smov (!%p165_p9), [#allocation3]  }
  0x13   : > { %v1057_v0 = vld [vmem:[%s1384_s1 + $0x14] ss:$8 sps:$4 sm:$0xff]   ;;  %v1059_v1 = vld [vmem:[%s1384_s1 + $0x10] ss:$8 sps:$4 sm:$0xff]   ;;  %v1145_v2 = vmov 0   ;;  %s190_s9 = scalar_select %p189_p10, %s1202_s19, 1  ;;  %v267_v49 = vlaneseq }
  0x14   : > { %256 = vmatprep.mubr.bf16.mxu0 %v1145_v2  ;;  %236 = vmatprep.subr.bf16.mxu0 %v1057_v0  ;;  %v1060_v3 = vld [vmem:[%s1384_s1 + $0x4] ss:$8 sps:$4 sm:$0xff]   ;;  %v1062_v4 = vld [vmem:[%s1384_s1] ss:$8 sps:$4 sm:$0xff]   ;;  %vm220_vm0 = vcmask 261120   ;;  %v1146_v7 = vmov 0.0  }
  0x15   : > { %237 = vmatpush1.bf16.msra.mxu0 %v1059_v1  ;;  %s902_s10 = sshll.u32 %s190_s9, 3  ;;  %948 = vmatprep.subr.bf16.mxu1 %v1146_v7  ;;  %vm1147_vm1 = vmmov 0   ;;  %vm341_vm2 = vcmask 1043456   ;;  %vm277_vm3 = vcmask 130048   ;;  %vm324_vm4 = vcmask 64512   ;;  %s1087_s7 = sshll.u32 %s1155_s6, 4  ;;  %s1088_s7 = int_to_ptr.vmem [resolvable:$false] %s1087_s7 }
  0x16   : > { %238 = vmatprep.subr.bf16.mxu0 %v1060_v3  ;;  %s192_s13 = scalar_lea.vmem %s1383_s0, %s902_s10  ;;  %950 = vmatprep.mubr.msk.bf16.mxu1 %vm1147_vm1, %v1146_v7  ;;  %v268_v52 = vshrl.u32 %v267_v49, 7  ;;  %v270_v53 = vand.u32 127, %v267_v49  ;;  %vm502_vm6 = vcmask 261248   ;;  %vm619_vm7 = vcmask 392448   ;;  %s1089_s8 = scalar_lea.vmem %s1088_s7, 256 }
  0x17   : > { %v194_v5 = vld [vmem:[%s192_s13] sm:$0xff]  ;;  %vm736_vm8 = vcmask 523648   ;;  %vm779_vm9 = vcmask 523264   ;;  %s901_s13 = sshll.u32 %s186_s12, 3 }
  0x18   : > { %v195_v6 = vpack.c.bf16 %v194_v5, %v194_v5  ;;  %vm271_vm5 = vcmp.ne.s32.totalorder %v268_v52, %v270_v53 }
  0x19   : > { %239 = vmatpush1.bf16.msra.mxu0 %v1062_v4  ;;  %v908_v56 = vsel %vm271_vm5, 1.0, %v1146_v7 }
  0x1a   : > { %954 = vmatprep.subr.bf16.mxu0 %v1146_v7 }
  0x1c   : > { %907 = vmatmul.mubr.msk.bf16.vlgmr.msra.gmra.mxu0 %vm220_vm0, %v195_v6 }
  0x1d   : > { %956 = vmatprep.mubr.msk.bf16.mxu0 %vm1147_vm1, %v1146_v7 }
  0xdc   : > { %v258_v8 = vpop.f32.mrf.mxu0 }
  0xdd   : > { %v265_v9 = vpack.c.bf16 %v258_v8, %v258_v8 }
  0xde   : > { %v260_v10 = vpop.f32.mrf.mxu0 }
  0xdf   : > { %v1253_v11 = vpack.c.bf16 %v260_v10, %v260_v10  ;;  %386 = vrot.lane.b32.xlu1 %v265_v9, %s1148_s14  ;;  %275 = vrot.lane.b32.xlu0 %v265_v9, %s1149_s20 }
  0xe0   : > { %v262_v12 = vpop.f32.mrf.mxu0 }
  0xe1   : > { %v343_v13 = vsel %vm341_vm2, %v1253_v11, 0 }
  0xe2   : > { %v263_v14 = vpop.f32.mrf.mxu0  ;;  %955 = vmatpush3.bf16.msra.mxu0 %v343_v13 }
  0xe3   : > { %506 = vrot.lane.b32.xlu1 %v265_v9, %s1150_s22  ;;  %388 = vrot.lane.b32.xlu0 %v265_v9, %s1151_s23 }
  0xe4   : > { %966 = vmatprep.subr.bf16.mxu0 %v1146_v7 }
  0xe7   : > { %623 = vrot.lane.b32.xlu1 %v265_v9, %s1152_s27  ;;  %504 = vrot.lane.b32.xlu0 %v265_v9, %s1153_s28 }
  0xeb   : > { %621 = vrot.lane.b32.xlu0 %v265_v9, %s1154_s29 }
 0x151   : > { %v276_v15 = vpop.permute.xlu0 %275  ;;  %v387_v18 = vpop.permute.xlu1 %386 }
 0x152   : > { %v282_v16 = vsel %vm277_vm3, %v276_v15, 0 }
 0x153   : > { %949 = vmatpush3.bf16.xpose.msra.mxu1 %v282_v16 }
 0x154   : > { %960 = vmatprep.subr.bf16.mxu1 %v1146_v7 }
 0x155   : > { %v389_v17 = vpop.permute.xlu0 %388  ;;  %v507_v20 = vpop.permute.xlu1 %506 }
 0x156   : > { %v394_v19 = vsel %vm277_vm3, %v389_v17, 0  ;;  %v512_v21 = vsel %vm277_vm3, %v507_v20, 0 }
 0x159   : > { %v624_v22 = vpop.permute.xlu1 %623  ;;  %v505_v23 = vpop.permute.xlu0 %504 }
 0x15a   : > { %951 = vmatmul.mubr.msk.bf16.vlgmr.msra.gmra.mxu1 %vm277_vm3, %v265_v9  ;;  %v629_v24 = vsel %vm277_vm3, %v624_v22, 0 }
 0x15b   : > { %961 = vmatpush3.bf16.xpose.msra.mxu1 %v394_v19  ;;  %962 = vmatprep.mubr.msk.bf16.mxu1 %vm1147_vm1, %v1146_v7 }
 0x15c   : > { %972 = vmatprep.subr.bf16.mxu1 %v1146_v7 }
 0x15d   : > { %v622_v25 = vpop.permute.xlu0 %621 }
 0x162   : > { %963 = vmatmul.mubr.msk.bf16.vlgmr.msra.gmra.mxu1 %vm277_vm3, %v387_v18 }
 0x163   : > { %973 = vmatpush3.bf16.xpose.msra.mxu1 %v512_v21  ;;  %974 = vmatprep.mubr.msk.bf16.mxu1 %vm1147_vm1, %v1146_v7 }
 0x164   : > { %984 = vmatprep.subr.bf16.mxu1 %v1146_v7 }
 0x16a   : > { %975 = vmatmul.mubr.msk.bf16.vlgmr.msra.gmra.mxu1 %vm277_vm3, %v505_v23 }
 0x16b   : > { %985 = vmatpush3.bf16.xpose.msra.mxu1 %v629_v24  ;;  %986 = vmatprep.mubr.msk.bf16.mxu1 %vm1147_vm1, %v1146_v7 }
 0x16c   : > { %996 = vmatprep.subr.bf16.mxu1 %v1146_v7 }
 0x172   : > { %987 = vmatmul.mubr.msk.bf16.vlgmr.msra.gmra.mxu1 %vm277_vm3, %v622_v25 }
 0x173   : > { %1004 = vmatprep.mubr.msk.bf16.mxu1 %vm1147_vm1, %v1146_v7 }
 0x21a   : > { %v318_v26 = vpop.f32.mrf.mxu1 }
 0x21b   : > { %v325_v27 = vsel %vm324_vm4, %v318_v26, -inf }
 0x21c   : > { %326 = vmax.xlane.f32.xlu1 %v325_v27  ;;  %v952_v28 = vpop.f32.mrf.mxu1 }
 0x21e   : > { %v321_v29 = vpop.f32.mrf.mxu1 }
 0x220   : > { %v953_v30 = vpop.f32.mrf.mxu1 }
 0x222   : > { %v430_v31 = vpop.f32.mrf.mxu1 }
 0x223   : > { %v436_v32 = vsel %vm324_vm4, %v430_v31, -inf }
 0x224   : > { %437 = vmax.xlane.f32.xlu0 %v436_v32  ;;  %v964_v33 = vpop.f32.mrf.mxu1 }
 0x226   : > { %v433_v34 = vpop.f32.mrf.mxu1 }
 0x228   : > { %v965_v35 = vpop.f32.mrf.mxu1 }
 0x22a   : > { %v548_v36 = vpop.f32.mrf.mxu1 }
 0x22b   : > { %v554_v37 = vsel %vm324_vm4, %v548_v36, -inf }
 0x22c   : > { %555 = vmax.xlane.f32.xlu0 %v554_v37  ;;  %v976_v38 = vpop.f32.mrf.mxu1 }
 0x22d   : > { %v1064_v38 = vld [vmem:[%s1385_s2 + $0x10] sm:$0xff]  }
 0x22e   : > { %v551_v39 = vpop.f32.mrf.mxu1 }
 0x230   : > { %v977_v40 = vpop.f32.mrf.mxu1 }
 0x232   : > { %v665_v41 = vpop.f32.mrf.mxu1 }
 0x233   : > { %v671_v42 = vsel %vm324_vm4, %v665_v41, -inf }
 0x234   : > { %672 = vmax.xlane.f32.xlu1 %v671_v42  ;;  %v988_v43 = vpop.f32.mrf.mxu1 }
 0x236   : > { %v668_v44 = vpop.f32.mrf.mxu1 }
 0x238   : > { %v989_v45 = vpop.f32.mrf.mxu1 }
 0x2a5   : > { %v327_v46 = vpop.xlane.xlu1 %326 }
 0x2a6   : > { %v328_v47 = vsub.f32 %v318_v26, %v327_v46 }
 0x2a8   : > { %v329_v48 = vmul.f32 1.442695, %v328_v47  ;;  %v1065_v47 = vld [vmem:[%s1385_s2 + $0x8] sm:$0xff]  }
 0x2aa   : > { %1067 = vpow2.f32 %v329_v48  ;;  %v1066_v48 = vld [vmem:[%s1385_s2] sm:$0xff]  }
 0x2ad   : > { %v438_v50 = vpop.xlane.xlu0 %437 }
 0x2ae   : > { %v439_v51 = vsub.f32 %v430_v31, %v438_v50 }
 0x2b0   : > { %v440_v54 = vmul.f32 1.442695, %v439_v51 }
 0x2b2   : > { %1069 = vpow2.f32 %v440_v54 }
 0x2b5   : > { %v556_v55 = vpop.xlane.xlu0 %555 }
 0x2b6   : > { %v557_v57 = vsub.f32 %v548_v36, %v556_v55  ;;  %v1063_v36 = vld [vmem:[%s1385_s2 + $0x18] sm:$0xff]  }
 0x2b7   : > { %v1068_v58 = vpop.eup %1067  ;;  %997 = vmatpush3.bf16.msra.mxu1 %v1063_v36 }
 0x2b8   : > { %v558_v59 = vmul.f32 1.442695, %v557_v57  ;;  %v331_v60 = vmul.f32 %v1068_v58, %v908_v56  ;;  %998 = vmatprep.subr.bf16.mxu1 %v1146_v7  ;;  %v917_v57 = vld [vmem:[%s1386_s3] ss:$0 sm:$0xff] }
 0x2ba   : > { %1071 = vpow2.f32 %v558_v59  ;;  %v332_v61 = vsel %vm324_vm4, %v331_v60, 0.0 }
 0x2bb   : > { %333 = vadd.xlane.f32.xlu0 %v332_v61  ;;  %999 = vmatpush3.bf16.msra.mxu1 %v1064_v38 }
 0x2bc   : > { %1000 = vmatprep.subr.bf16.mxu1 %v1146_v7 }
 0x2bd   : > { %v673_v4 = vpop.xlane.xlu1 %672 }
 0x2be   : > { %v674_v5 = vsub.f32 %v665_v41, %v673_v4 }
 0x2bf   : > { %v1070_v62 = vpop.eup %1069  ;;  %1001 = vmatpush3.bf16.msra.mxu1 %v1065_v47 }
 0x2c0   : > { %v442_v63 = vmul.f32 %v1070_v62, %v908_v56  ;;  %v675_v6 = vmul.f32 1.442695, %v674_v5  ;;  %1002 = vmatprep.subr.bf16.mxu1 %v1146_v7 }
 0x2c2   : > { %v443_v0 = vsel %vm324_vm4, %v442_v63, 0.0  ;;  %1073 = vpow2.f32 %v675_v6 }
 0x2c3   : > { %444 = vadd.xlane.f32.xlu1 %v443_v0  ;;  %1003 = vmatpush3.bf16.msra.mxu1 %v1066_v48 }
 0x2c7   : > { %v1072_v1 = vpop.eup %1071 }
 0x2c8   : > { %v560_v2 = vmul.f32 %v1072_v1, %v908_v56 }
 0x2ca   : > { %v561_v3 = vsel %vm324_vm4, %v560_v2, 0.0 }
 0x2cb   : > { %562 = vadd.xlane.f32.xlu0 %v561_v3 }
 0x2cf   : > { %v1074_v8 = vpop.eup %1073 }
 0x2d0   : > { %v677_v9 = vmul.f32 %v1074_v8, %v908_v56 }
 0x2d2   : > { %v678_v10 = vsel %vm324_vm4, %v677_v9, 0.0 }
 0x2d4   : > { %567 = vrot.lane.b32.xlu1 %v1253_v11, %s1153_s28 }
 0x2e1   : > { %450 = vrot.lane.b32.xlu0 %v1253_v11, %s1148_s14 }
 0x2f8   : > { %679 = vadd.xlane.f32.xlu1 %v678_v10 }
 0x309   : > { %684 = vrot.lane.b32.xlu1 %v1253_v11, %s1154_s29 }
 0x344   : > { %v334_v12 = vpop.xlane.xlu0 %333 }
 0x345   : > { %1075 = vrcp.f32 %v334_v12 }
 0x34c   : > { %v445_v13 = vpop.xlane.xlu1 %444 }
 0x34d   : > { %1077 = vrcp.f32 %v445_v13 }
 0x350   : > { %v568_v21 = vpop.permute.xlu1 %567 }
 0x351   : > { %v573_v23 = vsel %vm341_vm2, %v568_v21, 0 }
 0x352   : > { %v1076_v14 = vpop.eup %1075 }
 0x353   : > { %v336_v15 = vmul.f32 %v1076_v14, %v331_v60 }
 0x354   : > { %v563_v16 = vpop.xlane.xlu0 %562 }
 0x355   : > { %1079 = vrcp.f32 %v563_v16  ;;  %v337_v17 = vpack.c.bf16 %v336_v15, %v336_v15 }
 0x357   : > { %957 = vmatmul.mubr.msk.bf16.vlgmr.msra.gmra.mxu0 %vm324_vm4, %v337_v17 }
 0x358   : > { %v451_v18 = vpop.permute.xlu0 %450  ;;  %968 = vmatprep.mubr.msk.bf16.mxu0 %vm1147_vm1, %v1146_v7 }
 0x359   : > { %v456_v19 = vsel %vm341_vm2, %v451_v18, 0 }
 0x35a   : > { %v1078_v20 = vpop.eup %1077  ;;  %967 = vmatpush3.bf16.msra.mxu0 %v456_v19 }
 0x35b   : > { %978 = vmatprep.subr.bf16.mxu0 %v1146_v7  ;;  %v447_v11 = vmul.f32 %v1078_v20, %v442_v63 }
 0x35d   : > { %v448_v22 = vpack.c.bf16 %v447_v11, %v447_v11 }
 0x35f   : > { %969 = vmatmul.mubr.msk.bf16.vlgmr.msra.gmra.mxu0 %vm324_vm4, %v448_v22 }
 0x360   : > { %979 = vmatpush3.bf16.msra.mxu0 %v573_v23  ;;  %980 = vmatprep.mubr.msk.bf16.mxu0 %vm1147_vm1, %v1146_v7 }
 0x361   : > { %990 = vmatprep.subr.bf16.mxu0 %v1146_v7 }
 0x362   : > { %v1080_v24 = vpop.eup %1079 }
 0x363   : > { %v565_v25 = vmul.f32 %v1080_v24, %v560_v2 }
 0x365   : > { %v566_v26 = vpack.c.bf16 %v565_v25, %v565_v25 }
 0x367   : > { %981 = vmatmul.mubr.msk.bf16.vlgmr.msra.gmra.mxu0 %vm324_vm4, %v566_v26 }
 0x368   : > { %992 = vmatprep.mubr.msk.bf16.mxu0 %vm1147_vm1, %v1146_v7 }
 0x381   : > { %v680_v27 = vpop.xlane.xlu1 %679 }
 0x382   : > { %1081 = vrcp.f32 %v680_v27 }
 0x385   : > { %v685_v28 = vpop.permute.xlu1 %684 }
 0x386   : > { %v690_v29 = vsel %vm341_vm2, %v685_v28, 0 }
 0x387   : > { %991 = vmatpush3.bf16.msra.mxu0 %v690_v29 }
 0x38f   : > { %v1082_v30 = vpop.eup %1081 }
 0x390   : > { %v682_v31 = vmul.f32 %v1082_v30, %v677_v9 }
 0x392   : > { %v683_v32 = vpack.c.bf16 %v682_v31, %v682_v31 }
 0x394   : > { %993 = vmatmul.mubr.msk.bf16.vlgmr.msra.gmra.mxu0 %vm324_vm4, %v683_v32 }
 0x417   : > { %v379_v33 = vpop.f32.mrf.mxu0 }
 0x418   : > { %385 = vst.msk [vmem:[#allocation2] sm:$0xff] %vm277_vm3, %v379_v33 }
 0x419   : > { %v958_v34 = vpop.f32.mrf.mxu0 }
 0x41b   : > { %v382_v35 = vpop.f32.mrf.mxu0 }
 0x41d   : > { %v959_v37 = vpop.f32.mrf.mxu0 }
 0x41f   : > { %v492_v39 = vpop.f32.mrf.mxu0 }
 0x420   : > { %499 = vrot.lane.b32.xlu0 %v492_v39, %s1152_s27 }
 0x421   : > { %v970_v40 = vpop.f32.mrf.mxu0 }
 0x423   : > { %v495_v41 = vpop.f32.mrf.mxu0 }
 0x425   : > { %v971_v42 = vpop.f32.mrf.mxu0 }
 0x427   : > { %v609_v43 = vpop.f32.mrf.mxu0 }
 0x428   : > { %616 = vrot.lane.b32.xlu1 %v609_v43, %s1150_s22  ;;  %s924_s22 = sshll.u32 %s1202_s19, 7 }
 0x429   : > { %v982_v44 = vpop.f32.mrf.mxu0  ;;  %s1341_s30 = scalar_lea.hbm %s1387_s4, %s924_s22 }
 0x42b   : > { %v612_v45 = vpop.f32.mrf.mxu0 }
 0x42d   : > { %v983_v46 = vpop.f32.mrf.mxu0 }
 0x454   : > { %v726_v49 = vpop.f32.mrf.mxu0 }
 0x455   : > { %733 = vrot.lane.b32.xlu0 %v726_v49, %s1151_s23  ;;  %s188_s23 = scalar_lea.vmem [#allocation3], %s901_s13 }
 0x456   : > { %v994_v50 = vpop.f32.mrf.mxu0  ;;  %s838_s27 = sshll.u32 %s188_s23, 4  ;;  %s1343_s27 = int_to_ptr.vmem [resolvable:$true] %s838_s27 }
 0x457   : > { %s1083_s19 = scalar_lea.vmem %s1343_s27, 128  ;;  %p1090_p0 = scmp.lt.s32.totalorder %s1343_s27, %s1088_s7 }
 0x458   : > { %v729_v51 = vpop.f32.mrf.mxu0  ;;  %p1084_p11 = scmp.ne.s32.totalorder %s1343_s27, %s1083_s19  ;;  %p1091_p1 = scmp.lt.s32.totalorder %s1089_s8, %s1083_s19 }
 0x45a   : > { %v995_v52 = vpop.f32.mrf.mxu0  ;;  %p1085_p12 = pnand %p1084_p11, %p1219_p5  ;;  %p1092_p2 = por %p1091_p1, %p1090_p0 }
 0x45c   : > { %p1086_p13 = pneg %p1085_p12 }
 0x45e   : > { %p1093_p3 = pnand %p1092_p2, %p1086_p13 }
 0x492   : > { %v500_v53 = vpop.permute.xlu0 %499 }
 0x493   : > { %503 = vst.msk [vmem:[#allocation2] sm:$0xff] %vm502_vm6, %v500_v53 }
 0x49a   : > { %v617_v54 = vpop.permute.xlu1 %616 }
 0x49b   : > { %620 = vst.msk [vmem:[#allocation2] sm:$0xff] %vm619_vm7, %v617_v54 }
 0x4c7   : > { %v734_v55 = vpop.permute.xlu0 %733 }
 0x4c8   : > { %737 = vst.msk [vmem:[#allocation2] sm:$0xff] %vm736_vm8, %v734_v55 }
 0x4cf   : > { %v738_v56 = vld [vmem:[#allocation2] sm:$0xff] }
 0x4d0   : > { %v739_v7 = vpack.c.bf16 %v738_v56, %v738_v56 }
 0x4d2   : > { %1005 = vmatmul.mubr.msk.bf16.vlgmr.msra.gmra.mxu1 %vm779_vm9, %v739_v7 }
 0x592   : > { %v817_v58 = vpop.f32.mrf.mxu1 }
 0x593   : > { %v818_v59 = vadd.f32 %v917_v57, %v817_v58 }
 0x594   : > { %v1006_v60 = vpop.f32.mrf.mxu1 }
 0x595   : > { %823 = vst.msk [vmem:[%s188_s23] sm:$0xff] %vm220_vm0, %v818_v59 }
 0x596   : > { %v820_v61 = vpop.f32.mrf.mxu1 }
 0x597   : > { %1096 = shalt.err (!%p1093_p3)
}
 0x598   : > { %s1097_s9 = scalar_lea.hbm %s1341_s30, 128  ;;  %s1101_s12 = scalar_lea.hbm %s1387_s4, 256 }
 0x599   : > { %p1098_p4 = scmp.ne.s32.totalorder %s1341_s30, %s1097_s9  ;;  %p1102_p9 = scmp.lt.s32.totalorder %s1341_s30, %s1387_s4 }
 0x59a   : > { %p1103_p10 = scmp.lt.s32.totalorder %s1101_s12, %s1097_s9 }
 0x59b   : > { %p1099_p7 = pnand %p1098_p4, %p1219_p5 }
 0x59c   : > { %p1104_p11 = por %p1103_p10, %p1102_p9 }
 0x59d   : > { %p1100_p8 = pneg %p1099_p7 }
 0x59f   : > { %p1105_p12 = pnand %p1104_p11, %p1100_p8 }
 0x5a1   : > { %1108 = shalt.err (!%p1105_p12)
}
 0x5a2   : > { %1008 = dma.vmem_to_hbm [thread:$0]  (%p1219_p5), %s1343_s27, 128, %s1341_s30, %s825_s5   ;;  %v1007_v62 = vpop.f32.mrf.mxu1 }
 0x5a3 PF: > { %p1014_p13 = scmp.ge.s32.totalorder %s1143_s18, 2  ;;  %s850_s20 = sand.u32 1, %s1131_s15  }
 0x5a4   : > { %s851_s22 = scalar_lea.sflag [#allocation4], %s850_s20 }
 0x5a5   : > { %p1011_p0 = pnand %p1014_p13, %p1223_p6 }
 0x5a7   : > { %p1012_p1 = pneg %p1011_p0 }
 0x5a9   : > { %1126 = dma.done.wait (%p1012_p1), %s851_s22, 128  }
 0x5aa   : > { %1128 = vsyncadd (%p1012_p1), %s851_s22, 4294967168  ;;  %p14_p2 = scmp.ge.s32.totalorder %s1206_s21, 4   ;;  %s1390_s15 = smov %s1135_s16 }
 0x5ab   : > { %s1391_s16 = smov %s1139_s17  ;;  %s1392_s17 = smov %s1217_s24 }
 0x5ac   : > { %s1393_s18 = smov %s1206_s21  ;;  %16 = sbr.rel (!%p14_p2) target bundleno = 3 (0x3), region = 71 }
 0x5b1   :  { %856 = vsyncpa [#allocation4], 1 }
 0x5b2   :  { %858 = vsyncpa [#allocation4 + $0x1], 1 }

</bundles_post_ra>
